<compile_context>
chip_gen: v7x
topology: tpu7x:2x2x1
jax: 0.10.0
libtpu: 0.0.40
codegen_flags: <defaults>
</compile_context>

<pallas_src>
import functools

import jax
import jax.numpy as jnp
from jax.experimental import pallas as pl
from jax.experimental.pallas import tpu as pltpu

_MIB = 1024 * 1024
_ROW_ALIGN = 8  # sublane granularity of the batch tile


def _round_up(n, m):
    return ((n + m - 1) // m) * m


def _ceil_div(n, m):
    return -(-n // m)


def _vmem_capacity_bytes():
    """Physical VMEM of the local TPU (per TensorCore), with a safe fallback."""
    default = 64 * _MIB  # conservative: v7x-sized
    try:
        info = pltpu.get_tpu_info()
    except Exception:
        return default
    for name in ("vmem_capacity_bytes", "vmem_bytes", "vmem_size_bytes"):
        val = getattr(info, name, None)
        if val is None:
            continue
        try:
            val = int(val)
        except (TypeError, ValueError):
            continue
        if val > 0:
            return val
    return default


def _choose_tiling(batch):
    """Pick (batch-tile rows, vmem_limit_bytes) per TPU generation.

    v5e/v6e (128 MiB physical VMEM): up to 16384-row f32 x-tiles, 96 MiB budget.
    v7x (64 MiB VMEM per TC):        up to  8192-row f32 x-tiles, 44 MiB budget,
                                     plus an even step count so both
                                     TensorCores get full tiles.
    """
    vmem = _vmem_capacity_bytes()
    if vmem >= 96 * _MIB:            # v5e / v6e
        tile_rows_max = 16384
        vmem_limit = 96 * _MIB
        two_tensorcores = False
    else:                            # v7x, or unknown -> conservative
        tile_rows_max = 8192
        vmem_limit = 44 * _MIB
        two_tensorcores = True

    # Enough grid steps to overlap input DMA / compute / output DMA and to
    # feed both TensorCores on v7x; pure overhead for tiny batches.
    if batch >= 4096:
        min_steps = 4
    elif batch >= 512:
        min_steps = 2
    else:
        min_steps = 1

    n_steps = max(_ceil_div(batch, tile_rows_max), min_steps)
    if two_tensorcores and n_steps > 1 and n_steps % 2:
        n_steps += 1
    tile_rows = min(tile_rows_max,
                    max(_ROW_ALIGN,
                        _round_up(_ceil_div(batch, n_steps), _ROW_ALIGN)))
    return tile_rows, vmem_limit


def _prof_classifier_kernel(x_ref, w1_ref, b1_ref, w2_ref, b2_ref,
                            hid_ref, out_ref):
    # fc1 + relu: MXU matmul with f32 accumulation, bias + relu on the VPU.
    h = jnp.dot(x_ref[...], w1_ref[...],
                preferred_element_type=jnp.float32) + b1_ref[...]
    h = jnp.maximum(h, 0.0)

    # Dropout(p=0.7) is identity in eval/inference mode.
    # TODO(synk): training-mode dropout would need pltpu.prng_seed +
    #             pltpu.stateful_bernoulli and a 1/(1-p) rescale applied to `h`
    #             BEFORE both the hid store and the fc2 matmul.
    #
    # TODO(synk): a lane-dense (tile//4, 128) hid store would cut the masked
    #             vst count 4x, but the (tile, 32) -> (tile//4, 128) value
    #             regroup is a sublane->lane relayout that Mosaic's reshape
    #             does not guarantee to lower; skipped (kernel is DMA-bound
    #             and the (B, 32) output is already contiguous in HBM).
    hid_ref[...] = h.astype(hid_ref.dtype)

    # fc2 (tiny: K=32, N=2) -- fully hidden under the x DMA stream.
    out_ref[...] = (jnp.dot(h, w2_ref[...].astype(h.dtype),
                            preferred_element_type=jnp.float32)
                    + b2_ref[...]).astype(out_ref.dtype)


@functools.partial(jax.jit, static_argnames=("block_rows",))
def prof_classifier_forward(x, w1, b1, w2, b2, *, block_rows=None):
    """ProfClassifier forward: returns (hid, logits), both float32.

    x: (B, 256), w1: (256, 32), b1: (1, 32), w2: (32, 2), b2: (1, 2).
    Weights are stored pre-transposed as (in_features, out_features).
    x is streamed from HBM in whatever dtype the caller provides (pass bf16
    x / w1 to actually halve the dominant HBM read); no padding/cast/slice
    passes are added by this wrapper.
    """
    B, input_dim = x.shape
    hidden = w1.shape[1]
    num_classes = w2.shape[1]

    tile_rows, vmem_limit = _choose_tiling(B)
    if block_rows is not None:               # test / tuning override
        tile_rows = max(_ROW_ALIGN, _round_up(int(block_rows), _ROW_ALIGN))
    grid = (pl.cdiv(B, tile_rows),)          # ragged tail -> partial block, masked

    itemsize = jnp.dtype(x.dtype).itemsize
    cost = pl.CostEstimate(
        flops=2 * B * input_dim * hidden + 2 * B * hidden * num_classes,
        transcendentals=0,
        bytes_accessed=(B * input_dim * itemsize                  # x read
                        + B * hidden * 4 + B * num_classes * 4    # hid / logits
                        + (input_dim * hidden + hidden
                           + hidden * num_classes + num_classes) * 4))

    hid, logits = pl.pallas_call(
        _prof_classifier_kernel,
        out_shape=(
            jax.ShapeDtypeStruct((B, hidden), jnp.float32),
            jax.ShapeDtypeStruct((B, num_classes), jnp.float32),
        ),
        grid=grid,
        in_specs=[
            pl.BlockSpec((tile_rows, input_dim), lambda i: (i, 0)),  # x: streamed
            pl.BlockSpec((input_dim, hidden), lambda i: (0, 0)),     # w1: resident
            pl.BlockSpec((1, hidden), lambda i: (0, 0)),             # b1: resident
            pl.BlockSpec((hidden, num_classes), lambda i: (0, 0)),   # w2: resident
            pl.BlockSpec((1, num_classes), lambda i: (0, 0)),        # b2: resident
        ],
        out_specs=(
            pl.BlockSpec((tile_rows, hidden), lambda i: (i, 0)),
            pl.BlockSpec((tile_rows, num_classes), lambda i: (i, 0)),
        ),
        compiler_params=pltpu.CompilerParams(
            dimension_semantics=("parallel",),   # megacore split on v7x
            vmem_limit_bytes=vmem_limit,
        ),
        cost_estimate=cost,
    )(x, w1, b1, w2, b2)
    return hid, logits


def _init_params(key, input_dim=256, hidden=32, num_classes=2):
    """Deterministic init mimicking nn.Linear default U(-1/sqrt(fan_in), +)."""
    k1, k2, k3, k4 = jax.random.split(key, 4)
    bound1 = 1.0 / jnp.sqrt(input_dim)
    bound2 = 1.0 / jnp.sqrt(hidden)
    w1 = jax.random.uniform(k1, (input_dim, hidden), jnp.float32, -bound1, bound1)
    b1 = jax.random.uniform(k2, (1, hidden), jnp.float32, -bound1, bound1)
    w2 = jax.random.uniform(k3, (hidden, num_classes), jnp.float32, -bound2, bound2)
    b2 = jax.random.uniform(k4, (1, num_classes), jnp.float32, -bound2, bound2)
    return w1, b1, w2, b2


if __name__ == "__main__":
    key = jax.random.PRNGKey(0)
    k_x, k_p, k_x2 = jax.random.split(key, 3)

    INPUT_DIM, HIDDEN, NUM_CLASSES = 256, 32, 2
    w1, b1, w2, b2 = _init_params(k_p, INPUT_DIM, HIDDEN, NUM_CLASSES)

    def reference(xv):
        h = jnp.maximum(
            jnp.dot(xv, w1, precision=jax.lax.Precision.HIGHEST) + b1, 0.0)
        return h, jnp.dot(h, w2, precision=jax.lax.Precision.HIGHEST) + b2

    # 1) Small batch, single full block.
    B = 8
    x = jax.random.normal(k_x, (B, INPUT_DIM), jnp.float32)
    hid, logits = prof_classifier_forward(x, w1, b1, w2, b2)
    jax.block_until_ready((hid, logits))
    hid_r, logits_r = reference(x)
    assert hid.shape == (B, HIDDEN) and logits.shape == (B, NUM_CLASSES)
    assert hid.dtype == jnp.float32 and logits.dtype == jnp.float32
    assert bool(jnp.all(hid >= 0.0))
    assert jnp.allclose(hid, hid_r, atol=2e-2, rtol=2e-2)
    assert jnp.allclose(logits, logits_r, atol=2e-2, rtol=2e-2)

    # 2) Ragged batch across several grid steps (exercises partial-block
    #    read padding / write masking -- no wrapper-side pad or slice).
    B2 = 50
    x2 = jax.random.normal(k_x2, (B2, INPUT_DIM), jnp.float32)
    hid2, logits2 = prof_classifier_forward(x2, w1, b1, w2, b2, block_rows=16)
    jax.block_until_ready((hid2, logits2))
    hid2_r, logits2_r = reference(x2)
    assert hid2.shape == (B2, HIDDEN) and logits2.shape == (B2, NUM_CLASSES)
    assert jnp.allclose(hid2, hid2_r, atol=2e-2, rtol=2e-2)
    assert jnp.allclose(logits2, logits2_r, atol=2e-2, rtol=2e-2)

    print("KERNEL_OK")
</pallas_src>

<mosaic_0001>
module attributes {stable_mosaic.version = 11 : i64} {
  func.func @_prof_classifier_kernel(%arg0: i32, %arg1: memref<8x256xf32, #tpu.memory_space<vmem>>, %arg2: memref<256x32xf32, #tpu.memory_space<vmem>>, %arg3: memref<1x32xf32, #tpu.memory_space<vmem>>, %arg4: memref<32x2xf32, #tpu.memory_space<vmem>>, %arg5: memref<1x2xf32, #tpu.memory_space<vmem>>, %arg6: memref<8x32xf32, #tpu.memory_space<vmem>>, %arg7: memref<8x2xf32, #tpu.memory_space<vmem>>) attributes {dimension_semantics = [#tpu.dimension_semantics<parallel>], iteration_bounds = array<i64: 1>, scalar_prefetch = 0 : i64, scratch_operands = 0 : i64, tpu.core_type = #tpu.core_type<tc>, window_params = [{transform_indices = @transform_0, window_bounds = array<i64: 8, 256>}, {pipeline_mode = #tpu.pipeline_mode<synchronous>, transform_indices = @transform_1, window_bounds = array<i64: 256, 32>}, {pipeline_mode = #tpu.pipeline_mode<synchronous>, transform_indices = @transform_2, window_bounds = array<i64: 1, 32>}, {pipeline_mode = #tpu.pipeline_mode<synchronous>, transform_indices = @transform_3, window_bounds = array<i64: 32, 2>}, {pipeline_mode = #tpu.pipeline_mode<synchronous>, transform_indices = @transform_4, window_bounds = array<i64: 1, 2>}, {transform_indices = @transform_5, window_bounds = array<i64: 8, 32>}, {transform_indices = @transform_6, window_bounds = array<i64: 8, 2>}]} {
    %c0 = arith.constant 0 : index
    %c0_0 = arith.constant 0 : index
    %0 = vector.load %arg1[%c0, %c0_0] : memref<8x256xf32, #tpu.memory_space<vmem>>, vector<8x256xf32>
    %c0_1 = arith.constant 0 : index
    %c0_2 = arith.constant 0 : index
    %1 = vector.load %arg2[%c0_1, %c0_2] : memref<256x32xf32, #tpu.memory_space<vmem>>, vector<256x32xf32>
    %cst = arith.constant dense<0.000000e+00> : vector<8x32xf32>
    %2 = tpu.matmul %0, %1, %cst {dimension_numbers = #tpu.dot_dimension_numbers<[1], [0], [0], [1], [0, 0, 1, 1], [], []>} : vector<8x256xf32>, vector<256x32xf32>, vector<8x32xf32> -> vector<8x32xf32>
    %c0_3 = arith.constant 0 : index
    %c0_4 = arith.constant 0 : index
    %3 = vector.load %arg3[%c0_3, %c0_4] : memref<1x32xf32, #tpu.memory_space<vmem>>, vector<1x32xf32>
    %4 = vector.broadcast %3 : vector<1x32xf32> to vector<8x32xf32>
    %5 = arith.addf %2, %4 : vector<8x32xf32>
    %cst_5 = arith.constant 0.000000e+00 : f32
    %6 = vector.broadcast %cst_5 : f32 to vector<8x32xf32>
    %7 = arith.maximumf %5, %6 : vector<8x32xf32>
    %c0_6 = arith.constant 0 : index
    %c0_7 = arith.constant 0 : index
    %8 = vector.load %arg6[%c0_6, %c0_7] : memref<8x32xf32, #tpu.memory_space<vmem>>, vector<8x32xf32>
    tpu.vector_store %arg6[%c0_6, %c0_7], %7 {strides = array<i32>} : memref<8x32xf32, #tpu.memory_space<vmem>>, vector<8x32xf32>,
    %c0_8 = arith.constant 0 : index
    %c0_9 = arith.constant 0 : index
    %9 = vector.load %arg4[%c0_8, %c0_9] : memref<32x2xf32, #tpu.memory_space<vmem>>, vector<32x2xf32>
    %cst_10 = arith.constant dense<0.000000e+00> : vector<8x2xf32>
    %10 = tpu.matmul %7, %9, %cst_10 {dimension_numbers = #tpu.dot_dimension_numbers<[1], [0], [0], [1], [0, 0, 1, 1], [], []>} : vector<8x32xf32>, vector<32x2xf32>, vector<8x2xf32> -> vector<8x2xf32>
    %c0_11 = arith.constant 0 : index
    %c0_12 = arith.constant 0 : index
    %11 = vector.load %arg5[%c0_11, %c0_12] : memref<1x2xf32, #tpu.memory_space<vmem>>, vector<1x2xf32>
    %12 = vector.broadcast %11 : vector<1x2xf32> to vector<8x2xf32>
    %13 = arith.addf %10, %12 : vector<8x2xf32>
    %c0_13 = arith.constant 0 : index
    %c0_14 = arith.constant 0 : index
    %14 = vector.load %arg7[%c0_13, %c0_14] : memref<8x2xf32, #tpu.memory_space<vmem>>, vector<8x2xf32>
    tpu.vector_store %arg7[%c0_13, %c0_14], %13 {strides = array<i32>} : memref<8x2xf32, #tpu.memory_space<vmem>>, vector<8x2xf32>,
    return
  }
  func.func @transform_0(%arg0: i32) -> (i32, i32) {
    %c0_i32 = arith.constant 0 : i32
    %c0_i32_0 = arith.constant 0 : i32
    return %arg0, %c0_i32 : i32, i32
  }
  func.func @transform_1(%arg0: i32) -> (i32, i32) {
    %c0_i32 = arith.constant 0 : i32
    %c0_i32_0 = arith.constant 0 : i32
    %c0_i32_1 = arith.constant 0 : i32
    return %c0_i32, %c0_i32_0 : i32, i32
  }
  func.func @transform_2(%arg0: i32) -> (i32, i32) {
    %c0_i32 = arith.constant 0 : i32
    %c0_i32_0 = arith.constant 0 : i32
    %c0_i32_1 = arith.constant 0 : i32
    return %c0_i32, %c0_i32_0 : i32, i32
  }
  func.func @transform_3(%arg0: i32) -> (i32, i32) {
    %c0_i32 = arith.constant 0 : i32
    %c0_i32_0 = arith.constant 0 : i32
    %c0_i32_1 = arith.constant 0 : i32
    return %c0_i32, %c0_i32_0 : i32, i32
  }
  func.func @transform_4(%arg0: i32) -> (i32, i32) {
    %c0_i32 = arith.constant 0 : i32
    %c0_i32_0 = arith.constant 0 : i32
    %c0_i32_1 = arith.constant 0 : i32
    return %c0_i32, %c0_i32_0 : i32, i32
  }
  func.func @transform_5(%arg0: i32) -> (i32, i32) {
    %c0_i32 = arith.constant 0 : i32
    %c0_i32_0 = arith.constant 0 : i32
    return %arg0, %c0_i32 : i32, i32
  }
  func.func @transform_6(%arg0: i32) -> (i32, i32) {
    %c0_i32 = arith.constant 0 : i32
    %c0_i32_0 = arith.constant 0 : i32
    return %arg0, %c0_i32 : i32, i32
  }
}

</mosaic_0001>

<bundles_post_ra>
// kernel: prof_classifier_forward.1
= control target key start
LH: loop header
LB: loop body
LE: loop exit
PB: predicated region body
PF: predicated region fallthrough
CT: control target
= control target key end

     0   :  { %s535_s0 = inlined_call_operand.vmem [shape: f32[8,256], index: 0, kind: input, shape index: {}]   ;;  %s536_s1 = inlined_call_operand.vmem [shape: f32[256,32], index: 1, kind: input, shape index: {}]   ;;  %s537_s2 = inlined_call_operand.vmem [shape: f32[1,32], index: 2, kind: input, shape index: {}]   ;;  %s538_s3 = inlined_call_operand.vmem [shape: f32[32,2], index: 3, kind: input, shape index: {}]   ;;  %s539_s4 = inlined_call_operand.vmem [shape: f32[1,2], index: 4, kind: input, shape index: {}]   ;;  %s540_s5 = inlined_call_operand.hbm [shape: f32[8,32], index: 5, kind: output, shape index: {0}]   ;;  %s541_s6 = inlined_call_operand.vmem [shape: f32[8,2], index: 6, kind: output, shape index: {1}]  }
   0x1   :  { %v41_v0 = vld [vmem:[%s536_s1 + $0x80] sm:$0xff]  ;;  %v42_v1 = vld [vmem:[%s536_s1 + $0x88] sm:$0xff]  ;;  %v43_v5 = vld [vmem:[%s536_s1 + $0x90] sm:$0xff] }
   0x2   :  { %v25_v2 = vld [vmem:[%s536_s1] sm:$0xff]  ;;  %v295_v3 = vpack.c.bf16 %v42_v1, %v41_v0  ;;  %v26_v4 = vld [vmem:[%s536_s1 + $0x8] sm:$0xff]  ;;  %v44_v6 = vld [vmem:[%s536_s1 + $0x98] sm:$0xff] }
   0x3   :  { %v297_v7 = vpack.c.bf16 %v26_v4, %v25_v2  ;;  %v299_v8 = vpack.c.bf16 %v44_v6, %v43_v5  ;;  %v27_v9 = vld [vmem:[%s536_s1 + $0x10] sm:$0xff]  ;;  %v28_v10 = vld [vmem:[%s536_s1 + $0x18] sm:$0xff]  ;;  %v45_v11 = vld [vmem:[%s536_s1 + $0xa0] sm:$0xff] }
   0x4   :  { %296 = vmatprep.subr.bf16.mxu0 %v295_v3  ;;  %v46_v12 = vld [vmem:[%s536_s1 + $0xa8] sm:$0xff]  ;;  %v301_v13 = vpack.c.bf16 %v28_v10, %v27_v9  ;;  %v29_v15 = vld [vmem:[%s536_s1 + $0x20] sm:$0xff]  ;;  %v47_v17 = vld [vmem:[%s536_s1 + $0xb0] sm:$0xff] }
   0x5   :  { %298 = vmatpush3.bf16.msra.mxu0 %v297_v7  ;;  %v303_v14 = vpack.c.bf16 %v46_v12, %v45_v11  ;;  %v30_v16 = vld [vmem:[%s536_s1 + $0x28] sm:$0xff]  ;;  %v48_v18 = vld [vmem:[%s536_s1 + $0xb8] sm:$0xff]  ;;  %v31_v21 = vld [vmem:[%s536_s1 + $0x30] sm:$0xff] }
   0x6   :  { %300 = vmatprep.subr.bf16.mxu0 %v299_v8  ;;  %v305_v19 = vpack.c.bf16 %v30_v16, %v29_v15  ;;  %v307_v20 = vpack.c.bf16 %v48_v18, %v47_v17  ;;  %v32_v22 = vld [vmem:[%s536_s1 + $0x38] sm:$0xff]  ;;  %v49_v23 = vld [vmem:[%s536_s1 + $0xc0] sm:$0xff]  ;;  %v50_v24 = vld [vmem:[%s536_s1 + $0xc8] sm:$0xff] }
   0x7   :  { %v24_v25 = vld [vmem:[%s535_s0 + $0x8] sm:$0xff] }
   0x8   :  { %128 = vmatprep.mubr.f32.mxu0 %v24_v25 }
   0x9   :  { %302 = vmatpush3.bf16.msra.mxu0 %v301_v13 }
   0xa   :  { %304 = vmatprep.subr.bf16.mxu0 %v303_v14 }
   0xb   :  { %12 = vsyncpa [#allocation3], 0  ;;  %v309_v26 = vpack.c.bf16 %v32_v22, %v31_v21  ;;  %v311_v27 = vpack.c.bf16 %v50_v24, %v49_v23  ;;  %v33_v28 = vld [vmem:[%s536_s1 + $0x40] sm:$0xff]  ;;  %v34_v29 = vld [vmem:[%s536_s1 + $0x48] sm:$0xff]  ;;  %v361_v53 = vmov 0.0|0.0   ;;  %vm362_vm0 = vmmov 0  }
   0xc   :  { %v51_v30 = vld [vmem:[%s536_s1 + $0xd0] sm:$0xff]  ;;  %v52_v31 = vld [vmem:[%s536_s1 + $0xd8] sm:$0xff]  ;;  %v313_v32 = vpack.c.bf16 %v34_v29, %v33_v28  ;;  %v53_v36 = vld [vmem:[%s536_s1 + $0xe0] sm:$0xff]  ;;  %327 = vmatprep.subr.bf16.mxu1 %v361_v53  ;;  %v363_v57 = vmov 0.0   ;;  %vm135_vm1 = vcmask 261120   ;;  %s364_s25 = smov [#allocation2]  }
   0xd   :  { %306 = vmatpush3.bf16.msra.mxu0 %v305_v19  ;;  %v315_v33 = vpack.c.bf16 %v52_v31, %v51_v30  ;;  %v35_v34 = vld [vmem:[%s536_s1 + $0x50] sm:$0xff]  ;;  %v36_v35 = vld [vmem:[%s536_s1 + $0x58] sm:$0xff]  ;;  %v54_v37 = vld [vmem:[%s536_s1 + $0xe8] sm:$0xff]  ;;  %292 = vmatprep.mubr.msk.f32.mxu1 %vm362_vm0, %v363_v57  ;;  %s229_s26 = sshll.u32 %s364_s25, 4  ;;  %s230_s26 = int_to_ptr.vmem [resolvable:$true] %s229_s26 }
   0xe   :  { %308 = vmatprep.subr.bf16.mxu0 %v307_v20  ;;  %v317_v38 = vpack.c.bf16 %v36_v35, %v35_v34  ;;  %v319_v39 = vpack.c.bf16 %v54_v37, %v53_v36  ;;  %v37_v40 = vld [vmem:[%s536_s1 + $0x60] sm:$0xff]  ;;  %v38_v41 = vld [vmem:[%s536_s1 + $0x68] sm:$0xff]  ;;  %v55_v42 = vld [vmem:[%s536_s1 + $0xf0] sm:$0xff]  ;;  %p342_p1 = scmp.lt.s32.totalorder %s230_s26, %s230_s26 }
   0xf   :  { %v56_v43 = vld [vmem:[%s536_s1 + $0xf8] sm:$0xff]  ;;  %v321_v44 = vpack.c.bf16 %v38_v41, %v37_v40  ;;  %v39_v46 = vld [vmem:[%s536_s1 + $0x70] sm:$0xff]  ;;  %v23_v49 = vld [vmem:[%s535_s0] sm:$0xff] }
  0x10   :  { %v323_v45 = vpack.c.bf16 %v56_v43, %v55_v42  ;;  %v40_v47 = vld [vmem:[%s536_s1 + $0x78] sm:$0xff]  ;;  %v137_v50 = vld [vmem:[%s538_s3] sm:$0xff]  ;;  %v138_v51 = vld [vmem:[%s538_s3 + $0x8] sm:$0xff] }
  0x11   :  { %310 = vmatpush3.bf16.msra.mxu0 %v309_v26  ;;  %v325_v48 = vpack.c.bf16 %v40_v47, %v39_v46  ;;  %v328_v52 = vpack.c.bf16 %v138_v51, %v137_v50  ;;  %v139_v54 = vld [vmem:[%s538_s3 + $0x10] sm:$0xff]  ;;  %v140_v55 = vld [vmem:[%s538_s3 + $0x18] sm:$0xff]  ;;  %v241_v59 = vld [vmem:[%s537_s2] ss:$0 sm:$0xff]  ;;  %s337_s3 = scalar_lea.vmem %s230_s26, 128 }
  0x12   :  { %312 = vmatprep.subr.bf16.mxu0 %v311_v27  ;;  %v331_v56 = vpack.c.bf16 %v140_v55, %v139_v54  ;;  %p338_p0 = scmp.ne.s32.totalorder %s230_s26, %s337_s3  ;;  %p343_p2 = scmp.lt.s32.totalorder %s337_s3, %s337_s3 }
  0x13   :  { %329 = vmatpush3.bf16.msra.mxu1 %v328_v52 }
  0x14   :  { %330 = vmatprep.subr.bf16.mxu1 %v361_v53  ;;  %p344_p3 = por %p343_p2, %p342_p1 }
  0x15   :  { %314 = vmatpush3.bf16.msra.mxu0 %v313_v32 }
  0x16   :  { %316 = vmatprep.subr.bf16.mxu0 %v315_v33  ;;  %p345_p4 = pnand %p344_p3, %p338_p0 }
  0x17   :  { %332 = vmatpush3.bf16.msra.mxu1 %v331_v56 }
  0x19   :  { %318 = vmatpush3.bf16.msra.mxu0 %v317_v38 }
  0x1a   :  { %320 = vmatprep.subr.bf16.mxu0 %v319_v39 }
  0x1d   :  { %322 = vmatpush3.bf16.msra.mxu0 %v321_v44 }
  0x1e   :  { %324 = vmatprep.subr.bf16.mxu0 %v323_v45 }
  0x21   :  { %326 = vmatpush3.bf16.msra.mxu0 %v325_v48 }
  0x24   :  { %129 = vmatmul.mubr.f32.vlgmr.msra.gmra.mrb[0].mxu0 %v23_v49 }
  0xf7   :  { %v276_v58 = vpop.f32.mrb[0].mxu0 }
  0xf8   :  { %v277_v60 = vpop.f32.mrb[1].mxu0 }
  0xf9   :  { %v278_v61 = vadd.f32 %v277_v60, %v276_v58 }
  0xfb   :  { %v131_v62 = vadd.f32 %v278_v61, %v241_v59 }
  0xfd   :  { %v134_v63 = vmax.f32 %v131_v62, 0.0 }
  0xff   :  { %293 = vmatmul.mubr.msk.f32.vlgmr.msra.gmra.mrb[0].mxu1 %vm135_vm1, %v134_v63  ;;  %136 = vst.msk [vmem:[#allocation2] sm:$0xff] %vm135_vm1, %v134_v63 }
 0x100   :  { %348 = shalt.err (!%p345_p4)
}
 0x101   :  { %s349_s2 = scalar_lea.hbm %s540_s5, 128 }
 0x102   :  { %p350_p5 = scmp.ne.s32.totalorder %s540_s5, %s349_s2  ;;  %p353_p6 = scmp.lt.u32.totalorder %s349_s2, %s540_s5 }
 0x104   :  { %p355_p7 = pnand %p353_p6, %p350_p5 }
 0x106   :  { %358 = shalt.err (!%p355_p7)
}
 0x107   :  { %232 = dma.vmem_to_hbm [thread:$0]  %s230_s26, 128, %s540_s5, [#allocation3]   ;;  %v242_v0 = vld [vmem:[%s539_s4] ss:$0 sm:$0xff]  ;;  %vm221_vm2 = vcmask 15360  }
 0x1d2   :  { %v217_v1 = vpop.f32.mrb[0].mxu1 }
 0x1d3   :  { %v218_v2 = vadd.f32 %v242_v0, %v217_v1  ;;  %v294_v3 = vpop.f32.mrb[1].mxu1 }
 0x1d5   :  { %222 = vst.msk [vmem:[%s541_s6] sm:$0xff] %vm221_vm2, %v218_v2 }
 0x1d6   :  { %359 = dma.done.wait [#allocation3], 128  }
 0x1d7   :  { %360 = vsyncadd [#allocation3], 4294967168 }
 0x1d8   :  { %240 = vsyncpa [#allocation3], 1 }

</bundles_post_ra>
